<compile_context>
chip_gen: v5e
topology: v5e:2x2
jax: 0.10.0
libtpu: 0.0.40
codegen_flags: <defaults>
</compile_context>

<pallas_src>
import functools

import numpy as np
import jax
import jax.numpy as jnp
from jax.experimental import pallas as pl
from jax.experimental.pallas import tpu as pltpu


def _round_up(x, m):
    return ((x + m - 1) // m) * m


# ----------------------------------------------------------------------------
# Pallas kernel: fused focal-class cost + L1 box cdist + (-GIoU) cost block
# ----------------------------------------------------------------------------
def _cost_kernel(logits_ref, pbox_ref, tboxT_ref, c_ref, *,
                 class_w, coord_w, giou_w, alpha, gamma):
    # logits_ref : [TQ, 1]   pbox_ref : [TQ, 4]
    # tboxT_ref  : [4, S]    c_ref    : [TQ, S]   (S % 128 == 0, lane-dense)
    prob = jax.nn.sigmoid(logits_ref[...].astype(jnp.float32))            # [TQ, 1]
    one_m_prob = 1.0 - prob
    if gamma == 2.0:                                    # static: avoid float pow
        prob_g = prob * prob
        omp_g = one_m_prob * one_m_prob
    else:
        prob_g = prob ** gamma
        omp_g = one_m_prob ** gamma
    neg_cost_class = (1.0 - alpha) * prob_g * (-jnp.log(one_m_prob + 1e-8))
    pos_cost_class = alpha * omp_g * (-jnp.log(prob + 1e-8))
    cost_class = pos_cost_class - neg_cost_class                          # [TQ, 1]
    # Fold class weight and the "+1" constant of -giou into the narrow array.
    cc = class_w * cost_class + giou_w                                    # [TQ, 1]

    pb = pbox_ref[...].astype(jnp.float32)                                # [TQ, 4]
    tbT = tboxT_ref[...].astype(jnp.float32)                              # [4, S]

    pcx, pcy, pw, ph = pb[:, 0:1], pb[:, 1:2], pb[:, 2:3], pb[:, 3:4]     # [TQ, 1]
    tcx, tcy, tw, th = tbT[0:1, :], tbT[1:2, :], tbT[2:3, :], tbT[3:4, :] # [1, S]

    # L1 cdist (torch.cdist, p=1) in cxcywh space.
    cost_bbox = (jnp.abs(pcx - tcx) + jnp.abs(pcy - tcy)
                 + jnp.abs(pw - tw) + jnp.abs(ph - th))                   # [TQ, S]

    # box_cxcywh_to_xyxy
    px0, py0 = pcx - 0.5 * pw, pcy - 0.5 * ph
    px1, py1 = pcx + 0.5 * pw, pcy + 0.5 * ph
    tx0, ty0 = tcx - 0.5 * tw, tcy - 0.5 * th
    tx1, ty1 = tcx + 0.5 * tw, tcy + 0.5 * th

    # generalized_box_iou (narrow areas, wide intersection/union/enclosure)
    area_p = (px1 - px0) * (py1 - py0)                                    # [TQ, 1]
    area_t = (tx1 - tx0) * (ty1 - ty0)                                    # [1, S]
    inter_w = jnp.maximum(jnp.minimum(px1, tx1) - jnp.maximum(px0, tx0), 0.0)
    inter_h = jnp.maximum(jnp.minimum(py1, ty1) - jnp.maximum(py0, ty0), 0.0)
    inter = inter_w * inter_h                                             # [TQ, S]
    union = area_p + area_t - inter
    # Enclosing-box extents are >= 0 for valid boxes; no clamp needed.
    enc_area = ((jnp.maximum(px1, tx1) - jnp.minimum(px0, tx0))
                * (jnp.maximum(py1, ty1) - jnp.minimum(py0, ty0)))

    # giou = iou - (enc-union)/enc = inter/union + union/enc - 1; the "-1" is
    # folded into `cc`. Approx reciprocals run on the otherwise-idle EUP slot.
    rcp_union = pl.reciprocal(union, approx=True)
    rcp_enc = pl.reciprocal(enc_area, approx=True)
    giou_terms = inter * rcp_union + union * rcp_enc                      # [TQ, S]

    c_ref[...] = coord_w * cost_bbox - giou_w * giou_terms + cc


def compute_cost_blocks(logits, pboxes, tgt_boxes_T,
                        class_weight, coord_weight, giou_weight, alpha, gamma,
                        *, max_q_tile=1024, vmem_budget_bytes=8 * 1024 * 1024):
    """Per-image block-diagonal cost matrices.

    logits      : [bs, NQ_pad, 1]      (NQ_pad % 8 == 0)
    pboxes      : [bs, NQ_pad, 4]
    tgt_boxes_T : [bs, 4, S_pad]       (coords-major, S_pad % 128 == 0)
    returns C   : [bs, NQ_pad, S_pad]  float32
    """
    bs, nq_pad, nc = logits.shape
    s_pad = tgt_boxes_T.shape[-1]
    assert nc == 1, "DPText matcher assumes a single (text) class"
    assert nq_pad % 8 == 0 and s_pad % 128 == 0

    # Query-tile size: largest multiple of 8 whose double-buffered output tile
    # fits a conservative VMEM budget (v7x has only 64 MiB physical VMEM).
    rows_budget = max(8, (vmem_budget_bytes // (2 * 4 * s_pad)) // 8 * 8)
    tq = min(nq_pad, max_q_tile, rows_budget)
    while nq_pad % tq != 0:
        tq -= 8
    n_q_tiles = nq_pad // tq

    kernel = functools.partial(
        _cost_kernel,
        class_w=float(class_weight), coord_w=float(coord_weight),
        giou_w=float(giou_weight), alpha=float(alpha), gamma=float(gamma))

    return pl.pallas_call(
        kernel,
        out_shape=jax.ShapeDtypeStruct((bs, nq_pad, s_pad), jnp.float32),
        grid=(bs, n_q_tiles),
        in_specs=[
            pl.BlockSpec((None, tq, nc), lambda b, q: (b, q, 0)),
            pl.BlockSpec((None, tq, 4), lambda b, q: (b, q, 0)),
            pl.BlockSpec((None, 4, s_pad), lambda b, q: (b, 0, 0)),  # resident per image
        ],
        out_specs=pl.BlockSpec((None, tq, s_pad), lambda b, q: (b, q, 0)),
        compiler_params=pltpu.CompilerParams(
            dimension_semantics=("parallel", "parallel")),
    )(logits, pboxes, tgt_boxes_T)


# ----------------------------------------------------------------------------
# Hungarian assignment (host side). Uses scipy if present, else pure numpy.
# ----------------------------------------------------------------------------
try:
    from scipy.optimize import linear_sum_assignment as _lsa
except Exception:  # pragma: no cover
    def _lsa(cost):
        cost = np.asarray(cost, dtype=np.float64)
        transposed = cost.shape[0] > cost.shape[1]
        if transposed:
            cost = cost.T
        n, m = cost.shape
        u = np.zeros(n + 1); v = np.zeros(m + 1)
        p = np.zeros(m + 1, dtype=np.int64)
        way = np.zeros(m + 1, dtype=np.int64)
        for i in range(1, n + 1):
            p[0] = i
            j0 = 0
            minv = np.full(m + 1, np.inf)
            used = np.zeros(m + 1, dtype=bool)
            while True:
                used[j0] = True
                i0 = p[j0]; delta = np.inf; j1 = 0
                for j in range(1, m + 1):
                    if not used[j]:
                        cur = cost[i0 - 1, j - 1] - u[i0] - v[j]
                        if cur < minv[j]:
                            minv[j] = cur; way[j] = j0
                        if minv[j] < delta:
                            delta = minv[j]; j1 = j
                for j in range(m + 1):
                    if used[j]:
                        u[p[j]] += delta; v[j] -= delta
                    else:
                        minv[j] -= delta
                j0 = j1
                if p[j0] == 0:
                    break
            while j0 != 0:
                j1 = way[j0]; p[j0] = p[j1]; j0 = j1
        rows, cols = [], []
        for j in range(1, m + 1):
            if p[j] != 0:
                rows.append(p[j] - 1); cols.append(j - 1)
        rows = np.asarray(rows, dtype=np.int64)
        cols = np.asarray(cols, dtype=np.int64)
        if transposed:
            rows, cols = cols, rows
        order = np.argsort(rows)
        return rows[order], cols[order]


# ----------------------------------------------------------------------------
# JAX/Pallas BoxHungarianMatcher
# ----------------------------------------------------------------------------
_DUMMY_BOX = np.asarray([0.5, 0.5, 1.0, 1.0], np.float32)  # finite padding box


class BoxHungarianMatcher:
    def __init__(self, class_weight=1.0, coord_weight=1.0, giou_weight=1.0,
                 focal_alpha=0.25, focal_gamma=2.0):
        assert class_weight != 0 or coord_weight != 0 or giou_weight != 0, \
            "all costs cant be 0"
        self.class_weight = class_weight
        self.coord_weight = coord_weight
        self.giou_weight = giou_weight
        self.alpha = focal_alpha
        self.gamma = focal_gamma

    def __call__(self, outputs, targets):
        bs, num_queries = outputs["pred_logits"].shape[:2]
        # tgt labels are concatenated but unused by the reference forward
        # (no [:, tgt_ids] indexing in this module's cost_class).
        sizes = [int(v["boxes"].shape[0]) for v in targets]
        max_s = max(sizes) if sizes else 0
        if max_s == 0:  # no targets at all -> no kernel call (T=0 is invalid)
            empty = np.zeros((0,), dtype=np.int64)
            return [(empty, empty) for _ in range(bs)]

        nq_pad = _round_up(num_queries, 8)
        s_pad = _round_up(max_s, 128)

        logits = jnp.asarray(outputs["pred_logits"], jnp.float32)
        pboxes = jnp.asarray(outputs["pred_boxes"], jnp.float32)
        if nq_pad != num_queries:
            logits = jnp.pad(logits, ((0, 0), (0, nq_pad - num_queries), (0, 0)))
            pad_box = jnp.broadcast_to(jnp.asarray(_DUMMY_BOX),
                                       (bs, nq_pad - num_queries, 4))
            pboxes = jnp.concatenate([pboxes, pad_box], axis=1)

        # Per-image targets padded with finite dummy unit boxes; coords-major.
        tgt_np = np.tile(_DUMMY_BOX, (bs, s_pad, 1)).astype(np.float32)
        for b, v in enumerate(targets):
            if sizes[b] > 0:
                tgt_np[b, :sizes[b]] = np.asarray(v["boxes"], np.float32)
        tgt_T = jnp.asarray(np.transpose(tgt_np, (0, 2, 1)))          # [bs, 4, S_pad]

        C = compute_cost_blocks(
            logits, pboxes, tgt_T,
            self.class_weight, self.coord_weight, self.giou_weight,
            self.alpha, self.gamma)
        C_np = np.asarray(jax.block_until_ready(C))                   # single D->H copy

        # TODO(synk): linear_sum_assignment is sequential/host-side by nature.
        indices = []
        for b, s in enumerate(sizes):
            row, col = _lsa(C_np[b, :num_queries, :s])
            indices.append((np.asarray(row, dtype=np.int64),
                            np.asarray(col, dtype=np.int64)))
        return indices


# ----------------------------------------------------------------------------
# Pure-numpy reference (for a sanity check of the kernel's cost blocks)
# ----------------------------------------------------------------------------
def _cost_ref_np(logits, pbox, tbox, cw, bw, gw, alpha, gamma):
    prob = 1.0 / (1.0 + np.exp(-logits.astype(np.float64)))
    neg = (1 - alpha) * prob ** gamma * -np.log(1 - prob + 1e-8)
    pos = alpha * (1 - prob) ** gamma * -np.log(prob + 1e-8)
    cost_class = pos - neg
    cost_bbox = np.abs(pbox[:, None, :] - tbox[None, :, :]).sum(-1)

    def to_xyxy(b):
        cx, cy, w, h = b[:, 0], b[:, 1], b[:, 2], b[:, 3]
        return np.stack([cx - 0.5 * w, cy - 0.5 * h, cx + 0.5 * w, cy + 0.5 * h], -1)

    p, t = to_xyxy(pbox.astype(np.float64)), to_xyxy(tbox.astype(np.float64))
    ap = (p[:, 2] - p[:, 0]) * (p[:, 3] - p[:, 1])
    at = (t[:, 2] - t[:, 0]) * (t[:, 3] - t[:, 1])
    lt = np.maximum(p[:, None, :2], t[None, :, :2])
    rb = np.minimum(p[:, None, 2:], t[None, :, 2:])
    inter = np.clip(rb - lt, 0, None).prod(-1)
    union = ap[:, None] + at[None, :] - inter
    iou = inter / union
    elt = np.minimum(p[:, None, :2], t[None, :, :2])
    erb = np.maximum(p[:, None, 2:], t[None, :, 2:])
    enc = np.clip(erb - elt, 0, None).prod(-1)
    giou = iou - (enc - union) / enc
    return bw * cost_bbox + cw * cost_class + gw * (-giou)


if __name__ == "__main__":
    bs, num_queries, num_classes = 2, 16, 1
    key = jax.random.PRNGKey(0)
    k1, k2, k3 = jax.random.split(key, 3)

    pred_logits = jax.random.normal(k1, (bs, num_queries, num_classes), jnp.float32)
    pred_boxes = jax.nn.sigmoid(jax.random.normal(k2, (bs, num_queries, 4), jnp.float32))
    outputs = {"pred_logits": pred_logits, "pred_boxes": pred_boxes}

    sizes = [3, 2]
    targets = []
    tkeys = jax.random.split(k3, len(sizes))
    for s, tk in zip(sizes, tkeys):
        ka, kb = jax.random.split(tk)
        cxcy = 0.2 + 0.6 * jax.random.uniform(ka, (s, 2), jnp.float32)
        wh = 0.05 + 0.25 * jax.random.uniform(kb, (s, 2), jnp.float32)
        targets.append({
            "boxes": jnp.concatenate([cxcy, wh], axis=-1),
            "labels": jnp.zeros((s,), jnp.int32),
        })

    cw, bw, gw, alpha, gamma = 2.0, 5.0, 2.0, 0.25, 2.0
    matcher = BoxHungarianMatcher(class_weight=cw, coord_weight=bw, giou_weight=gw,
                                  focal_alpha=alpha, focal_gamma=gamma)

    # ---- sanity check: kernel cost blocks vs. numpy reference ---------------
    nq_pad = _round_up(num_queries, 8)
    s_pad = _round_up(max(sizes), 128)
    logits_np = np.asarray(pred_logits)
    pbox_np = np.asarray(pred_boxes)
    tgt_np = np.tile(_DUMMY_BOX, (bs, s_pad, 1)).astype(np.float32)
    for b in range(bs):
        tgt_np[b, :sizes[b]] = np.asarray(targets[b]["boxes"])
    tgt_T = jnp.asarray(np.transpose(tgt_np, (0, 2, 1)))

    C = compute_cost_blocks(jnp.asarray(logits_np), jnp.asarray(pbox_np), tgt_T,
                            cw, bw, gw, alpha, gamma)
    C = np.asarray(jax.block_until_ready(C))

    # also exercise the query-tiled path (grid > 1 along the query axis)
    C_tiled = compute_cost_blocks(jnp.asarray(logits_np), jnp.asarray(pbox_np), tgt_T,
                                  cw, bw, gw, alpha, gamma, max_q_tile=8)
    C_tiled = np.asarray(jax.block_until_ready(C_tiled))
    assert np.allclose(C, C_tiled, rtol=1e-6, atol=1e-6), "tiled path mismatch"

    for b in range(bs):
        ref = _cost_ref_np(logits_np[b], pbox_np[b], np.asarray(targets[b]["boxes"]),
                           cw, bw, gw, alpha, gamma)
        got = C[b, :num_queries, :sizes[b]]
        # tolerance loosened for approx (EUP) reciprocals in the GIoU path
        assert np.allclose(got, ref, rtol=1e-2, atol=2e-2), "cost block mismatch"

    indices = matcher(outputs, targets)
    assert len(indices) == bs
    for (i_idx, j_idx), s in zip(indices, sizes):
        assert len(i_idx) == len(j_idx) == min(num_queries, s)
        assert i_idx.dtype == np.int64 and j_idx.dtype == np.int64

    print("KERNEL_OK")
</pallas_src>

<mosaic_0001>
module attributes {stable_mosaic.version = 11 : i64} {
  func.func @_cost_kernel(%arg0: i32, %arg1: i32, %arg2: memref<1x16x1xf32, #tpu.memory_space<vmem>>, %arg3: memref<1x16x4xf32, #tpu.memory_space<vmem>>, %arg4: memref<1x4x128xf32, #tpu.memory_space<vmem>>, %arg5: memref<1x16x128xf32, #tpu.memory_space<vmem>>) attributes {dimension_semantics = [#tpu.dimension_semantics<parallel>, #tpu.dimension_semantics<parallel>], iteration_bounds = array<i64: 2, 1>, scalar_prefetch = 0 : i64, scratch_operands = 0 : i64, tpu.core_type = #tpu.core_type<tc>, window_params = [{transform_indices = @transform_0, window_bounds = array<i64: 1, 16, 1>}, {transform_indices = @transform_1, window_bounds = array<i64: 1, 16, 4>}, {transform_indices = @transform_2, window_bounds = array<i64: 1, 4, 128>}, {transform_indices = @transform_3, window_bounds = array<i64: 1, 16, 128>}]} {
    %c0 = arith.constant 0 : index
    %c0_0 = arith.constant 0 : index
    %c0_1 = arith.constant 0 : index
    %0 = vector.load %arg2[%c0, %c0_0, %c0_1] : memref<1x16x1xf32, #tpu.memory_space<vmem>>, vector<1x16x1xf32>
    %1 = vector.shape_cast %0 : vector<1x16x1xf32> to vector<16x1xf32>
    %2 = arith.negf %1 : vector<16x1xf32>
    %3 = math.exp %2 : vector<16x1xf32>
    %cst = arith.constant 1.000000e+00 : f32
    %4 = vector.broadcast %cst : f32 to vector<16x1xf32>
    %5 = arith.addf %4, %3 : vector<16x1xf32>
    %6 = arith.divf %4, %5 : vector<16x1xf32>
    %cst_2 = arith.constant 1.000000e+00 : f32
    %7 = vector.broadcast %cst_2 : f32 to vector<16x1xf32>
    %8 = arith.subf %7, %6 : vector<16x1xf32>
    %9 = arith.mulf %6, %6 : vector<16x1xf32>
    %10 = arith.mulf %8, %8 : vector<16x1xf32>
    %cst_3 = arith.constant 7.500000e-01 : f32
    %11 = vector.broadcast %cst_3 : f32 to vector<16x1xf32>
    %12 = arith.mulf %11, %9 : vector<16x1xf32>
    %cst_4 = arith.constant 9.99999993E-9 : f32
    %13 = vector.broadcast %cst_4 : f32 to vector<16x1xf32>
    %14 = arith.addf %8, %13 : vector<16x1xf32>
    %15 = math.log %14 : vector<16x1xf32>
    %cst_5 = arith.constant 0.000000e+00 : f32
    %16 = vector.broadcast %cst_5 : f32 to vector<16x1xf32>
    %17 = arith.subf %16, %15 : vector<16x1xf32>
    %18 = arith.mulf %12, %17 : vector<16x1xf32>
    %cst_6 = arith.constant 2.500000e-01 : f32
    %19 = vector.broadcast %cst_6 : f32 to vector<16x1xf32>
    %20 = arith.mulf %19, %10 : vector<16x1xf32>
    %cst_7 = arith.constant 9.99999993E-9 : f32
    %21 = vector.broadcast %cst_7 : f32 to vector<16x1xf32>
    %22 = arith.addf %6, %21 : vector<16x1xf32>
    %23 = math.log %22 : vector<16x1xf32>
    %cst_8 = arith.constant 0.000000e+00 : f32
    %24 = vector.broadcast %cst_8 : f32 to vector<16x1xf32>
    %25 = arith.subf %24, %23 : vector<16x1xf32>
    %26 = arith.mulf %20, %25 : vector<16x1xf32>
    %27 = arith.subf %26, %18 : vector<16x1xf32>
    %cst_9 = arith.constant 2.000000e+00 : f32
    %28 = vector.broadcast %cst_9 : f32 to vector<16x1xf32>
    %29 = arith.mulf %28, %27 : vector<16x1xf32>
    %cst_10 = arith.constant 2.000000e+00 : f32
    %30 = vector.broadcast %cst_10 : f32 to vector<16x1xf32>
    %31 = arith.addf %29, %30 : vector<16x1xf32>
    %c0_11 = arith.constant 0 : index
    %c0_12 = arith.constant 0 : index
    %c0_13 = arith.constant 0 : index
    %32 = vector.load %arg3[%c0_11, %c0_12, %c0_13] : memref<1x16x4xf32, #tpu.memory_space<vmem>>, vector<1x16x4xf32>
    %33 = vector.shape_cast %32 : vector<1x16x4xf32> to vector<16x4xf32>
    %c0_14 = arith.constant 0 : index
    %c0_15 = arith.constant 0 : index
    %c0_16 = arith.constant 0 : index
    %34 = vector.load %arg4[%c0_14, %c0_15, %c0_16] : memref<1x4x128xf32, #tpu.memory_space<vmem>>, vector<1x4x128xf32>
    %35 = vector.shape_cast %34 : vector<1x4x128xf32> to vector<4x128xf32>
    %36 = vector.extract_strided_slice %33 {offsets = [0, 0], sizes = [16, 1], strides = [1, 1]} : vector<16x4xf32> to vector<16x1xf32>
    %37 = vector.extract_strided_slice %33 {offsets = [0, 1], sizes = [16, 1], strides = [1, 1]} : vector<16x4xf32> to vector<16x1xf32>
    %38 = vector.extract_strided_slice %33 {offsets = [0, 2], sizes = [16, 1], strides = [1, 1]} : vector<16x4xf32> to vector<16x1xf32>
    %39 = vector.extract_strided_slice %33 {offsets = [0, 3], sizes = [16, 1], strides = [1, 1]} : vector<16x4xf32> to vector<16x1xf32>
    %40 = vector.extract_strided_slice %35 {offsets = [0, 0], sizes = [1, 128], strides = [1, 1]} : vector<4x128xf32> to vector<1x128xf32>
    %41 = vector.extract_strided_slice %35 {offsets = [1, 0], sizes = [1, 128], strides = [1, 1]} : vector<4x128xf32> to vector<1x128xf32>
    %42 = vector.extract_strided_slice %35 {offsets = [2, 0], sizes = [1, 128], strides = [1, 1]} : vector<4x128xf32> to vector<1x128xf32>
    %43 = vector.extract_strided_slice %35 {offsets = [3, 0], sizes = [1, 128], strides = [1, 1]} : vector<4x128xf32> to vector<1x128xf32>
    %44 = vector.broadcast %36 : vector<16x1xf32> to vector<16x128xf32>
    %45 = vector.broadcast %40 : vector<1x128xf32> to vector<16x128xf32>
    %46 = arith.subf %44, %45 : vector<16x128xf32>
    %47 = math.absf %46 : vector<16x128xf32>
    %48 = vector.broadcast %37 : vector<16x1xf32> to vector<16x128xf32>
    %49 = vector.broadcast %41 : vector<1x128xf32> to vector<16x128xf32>
    %50 = arith.subf %48, %49 : vector<16x128xf32>
    %51 = math.absf %50 : vector<16x128xf32>
    %52 = arith.addf %47, %51 : vector<16x128xf32>
    %53 = vector.broadcast %38 : vector<16x1xf32> to vector<16x128xf32>
    %54 = vector.broadcast %42 : vector<1x128xf32> to vector<16x128xf32>
    %55 = arith.subf %53, %54 : vector<16x128xf32>
    %56 = math.absf %55 : vector<16x128xf32>
    %57 = arith.addf %52, %56 : vector<16x128xf32>
    %58 = vector.broadcast %39 : vector<16x1xf32> to vector<16x128xf32>
    %59 = vector.broadcast %43 : vector<1x128xf32> to vector<16x128xf32>
    %60 = arith.subf %58, %59 : vector<16x128xf32>
    %61 = math.absf %60 : vector<16x128xf32>
    %62 = arith.addf %57, %61 : vector<16x128xf32>
    %cst_17 = arith.constant 5.000000e-01 : f32
    %63 = vector.broadcast %cst_17 : f32 to vector<16x1xf32>
    %64 = arith.mulf %63, %38 : vector<16x1xf32>
    %65 = arith.subf %36, %64 : vector<16x1xf32>
    %cst_18 = arith.constant 5.000000e-01 : f32
    %66 = vector.broadcast %cst_18 : f32 to vector<16x1xf32>
    %67 = arith.mulf %66, %39 : vector<16x1xf32>
    %68 = arith.subf %37, %67 : vector<16x1xf32>
    %cst_19 = arith.constant 5.000000e-01 : f32
    %69 = vector.broadcast %cst_19 : f32 to vector<16x1xf32>
    %70 = arith.mulf %69, %38 : vector<16x1xf32>
    %71 = arith.addf %36, %70 : vector<16x1xf32>
    %cst_20 = arith.constant 5.000000e-01 : f32
    %72 = vector.broadcast %cst_20 : f32 to vector<16x1xf32>
    %73 = arith.mulf %72, %39 : vector<16x1xf32>
    %74 = arith.addf %37, %73 : vector<16x1xf32>
    %cst_21 = arith.constant 5.000000e-01 : f32
    %75 = vector.broadcast %cst_21 : f32 to vector<1x128xf32>
    %76 = arith.mulf %75, %42 : vector<1x128xf32>
    %77 = arith.subf %40, %76 : vector<1x128xf32>
    %cst_22 = arith.constant 5.000000e-01 : f32
    %78 = vector.broadcast %cst_22 : f32 to vector<1x128xf32>
    %79 = arith.mulf %78, %43 : vector<1x128xf32>
    %80 = arith.subf %41, %79 : vector<1x128xf32>
    %cst_23 = arith.constant 5.000000e-01 : f32
    %81 = vector.broadcast %cst_23 : f32 to vector<1x128xf32>
    %82 = arith.mulf %81, %42 : vector<1x128xf32>
    %83 = arith.addf %40, %82 : vector<1x128xf32>
    %cst_24 = arith.constant 5.000000e-01 : f32
    %84 = vector.broadcast %cst_24 : f32 to vector<1x128xf32>
    %85 = arith.mulf %84, %43 : vector<1x128xf32>
    %86 = arith.addf %41, %85 : vector<1x128xf32>
    %87 = arith.subf %71, %65 : vector<16x1xf32>
    %88 = arith.subf %74, %68 : vector<16x1xf32>
    %89 = arith.mulf %87, %88 : vector<16x1xf32>
    %90 = arith.subf %83, %77 : vector<1x128xf32>
    %91 = arith.subf %86, %80 : vector<1x128xf32>
    %92 = arith.mulf %90, %91 : vector<1x128xf32>
    %93 = vector.broadcast %71 : vector<16x1xf32> to vector<16x128xf32>
    %94 = vector.broadcast %83 : vector<1x128xf32> to vector<16x128xf32>
    %95 = arith.minimumf %93, %94 : vector<16x128xf32>
    %96 = vector.broadcast %65 : vector<16x1xf32> to vector<16x128xf32>
    %97 = vector.broadcast %77 : vector<1x128xf32> to vector<16x128xf32>
    %98 = arith.maximumf %96, %97 : vector<16x128xf32>
    %99 = arith.subf %95, %98 : vector<16x128xf32>
    %cst_25 = arith.constant 0.000000e+00 : f32
    %100 = vector.broadcast %cst_25 : f32 to vector<16x128xf32>
    %101 = arith.maximumf %99, %100 : vector<16x128xf32>
    %102 = vector.broadcast %74 : vector<16x1xf32> to vector<16x128xf32>
    %103 = vector.broadcast %86 : vector<1x128xf32> to vector<16x128xf32>
    %104 = arith.minimumf %102, %103 : vector<16x128xf32>
    %105 = vector.broadcast %68 : vector<16x1xf32> to vector<16x128xf32>
    %106 = vector.broadcast %80 : vector<1x128xf32> to vector<16x128xf32>
    %107 = arith.maximumf %105, %106 : vector<16x128xf32>
    %108 = arith.subf %104, %107 : vector<16x128xf32>
    %cst_26 = arith.constant 0.000000e+00 : f32
    %109 = vector.broadcast %cst_26 : f32 to vector<16x128xf32>
    %110 = arith.maximumf %108, %109 : vector<16x128xf32>
    %111 = arith.mulf %101, %110 : vector<16x128xf32>
    %112 = vector.broadcast %89 : vector<16x1xf32> to vector<16x128xf32>
    %113 = vector.broadcast %92 : vector<1x128xf32> to vector<16x128xf32>
    %114 = arith.addf %112, %113 : vector<16x128xf32>
    %115 = arith.subf %114, %111 : vector<16x128xf32>
    %116 = vector.broadcast %71 : vector<16x1xf32> to vector<16x128xf32>
    %117 = vector.broadcast %83 : vector<1x128xf32> to vector<16x128xf32>
    %118 = arith.maximumf %116, %117 : vector<16x128xf32>
    %119 = vector.broadcast %65 : vector<16x1xf32> to vector<16x128xf32>
    %120 = vector.broadcast %77 : vector<1x128xf32> to vector<16x128xf32>
    %121 = arith.minimumf %119, %120 : vector<16x128xf32>
    %122 = arith.subf %118, %121 : vector<16x128xf32>
    %123 = vector.broadcast %74 : vector<16x1xf32> to vector<16x128xf32>
    %124 = vector.broadcast %86 : vector<1x128xf32> to vector<16x128xf32>
    %125 = arith.maximumf %123, %124 : vector<16x128xf32>
    %126 = vector.broadcast %68 : vector<16x1xf32> to vector<16x128xf32>
    %127 = vector.broadcast %80 : vector<1x128xf32> to vector<16x128xf32>
    %128 = arith.minimumf %126, %127 : vector<16x128xf32>
    %129 = arith.subf %125, %128 : vector<16x128xf32>
    %130 = arith.mulf %122, %129 : vector<16x128xf32>
    %131 = tpu.reciprocal %115 {approx = true} : vector<16x128xf32> -> vector<16x128xf32>
    %132 = tpu.reciprocal %130 {approx = true} : vector<16x128xf32> -> vector<16x128xf32>
    %133 = arith.mulf %111, %131 : vector<16x128xf32>
    %134 = arith.mulf %115, %132 : vector<16x128xf32>
    %135 = arith.addf %133, %134 : vector<16x128xf32>
    %cst_27 = arith.constant 5.000000e+00 : f32
    %136 = vector.broadcast %cst_27 : f32 to vector<16x128xf32>
    %137 = arith.mulf %136, %62 : vector<16x128xf32>
    %cst_28 = arith.constant 2.000000e+00 : f32
    %138 = vector.broadcast %cst_28 : f32 to vector<16x128xf32>
    %139 = arith.mulf %138, %135 : vector<16x128xf32>
    %140 = arith.subf %137, %139 : vector<16x128xf32>
    %141 = vector.broadcast %31 : vector<16x1xf32> to vector<16x128xf32>
    %142 = arith.addf %140, %141 : vector<16x128xf32>
    %c0_29 = arith.constant 0 : index
    %c0_30 = arith.constant 0 : index
    %c0_31 = arith.constant 0 : index
    %143 = vector.load %arg5[%c0_29, %c0_30, %c0_31] : memref<1x16x128xf32, #tpu.memory_space<vmem>>, vector<1x16x128xf32>
    %144 = vector.shape_cast %143 : vector<1x16x128xf32> to vector<16x128xf32>
    %145 = vector.shape_cast %142 : vector<16x128xf32> to vector<1x16x128xf32>
    tpu.vector_store %arg5[%c0_29, %c0_30, %c0_31], %145 {strides = array<i32>} : memref<1x16x128xf32, #tpu.memory_space<vmem>>, vector<1x16x128xf32>,
    return
  }
  func.func @transform_0(%arg0: i32, %arg1: i32) -> (i32, i32, i32) {
    %c0_i32 = arith.constant 0 : i32
    %c0_i32_0 = arith.constant 0 : i32
    return %arg0, %arg1, %c0_i32 : i32, i32, i32
  }
  func.func @transform_1(%arg0: i32, %arg1: i32) -> (i32, i32, i32) {
    %c0_i32 = arith.constant 0 : i32
    %c0_i32_0 = arith.constant 0 : i32
    return %arg0, %arg1, %c0_i32 : i32, i32, i32
  }
  func.func @transform_2(%arg0: i32, %arg1: i32) -> (i32, i32, i32) {
    %c0_i32 = arith.constant 0 : i32
    %c0_i32_0 = arith.constant 0 : i32
    %c0_i32_1 = arith.constant 0 : i32
    return %arg0, %c0_i32, %c0_i32_0 : i32, i32, i32
  }
  func.func @transform_3(%arg0: i32, %arg1: i32) -> (i32, i32, i32) {
    %c0_i32 = arith.constant 0 : i32
    %c0_i32_0 = arith.constant 0 : i32
    return %arg0, %arg1, %c0_i32 : i32, i32, i32
  }
}

</mosaic_0001>

<bundles_post_ra>
// kernel: tpu_custom_call.1
= control target key start
LH: loop header
LB: loop body
LE: loop exit
PB: predicated region body
PF: predicated region fallthrough
CT: control target
= control target key end

     0   :  { %8 = vsyncpa [#allocation3], 0  ;;  %s1049_s0 = inlined_call_operand.vmem [shape: f32[2,16,1], index: 0, kind: input, shape index: {}]   ;;  %s1050_s1 = inlined_call_operand.vmem [shape: f32[2,16,4], index: 1, kind: input, shape index: {}]   ;;  %s1051_s2 = inlined_call_operand.vmem [shape: f32[2,4,128], index: 2, kind: input, shape index: {}]   ;;  %s1052_s3 = inlined_call_operand.hbm [shape: f32[2,16,128], index: 3, kind: output, shape index: {}]  }
   0x1   :  { %10 = vsyncpa [#allocation3 + $0x1], 0  ;;  %s904_s12 = smov 0   ;;  %s906_s13 = smov 0  }
   0x2   :  { %s908_s14 = smov 0   ;;  %s910_s15 = smov 0  }
   0x3   :  { %s912_s16 = smov 0   ;;  %s914_s17 = smov 0  }
   0x4 LB: > { %s673_s18 = sadd.s32 4294967295, %s874_s17   ;;  %s674_s19 = sadd.s32 4294967294, %s874_s17   ;;  %s874_s17 = sphi %s914_s17, %s16_s17   ;;  %s870_s16 = sphi %s912_s16, %s1059_s16   ;;  %s866_s15 = sphi %s910_s15, %s1058_s15   ;;  %s862_s14 = sphi %s908_s14, %s1057_s14   ;;  %s858_s13 = sphi %s906_s13, %s1056_s13   ;;  %s854_s12 = sphi %s904_s12, %s1055_s12  }
   0x5   : > { %s28_s20 = sadd.s32 1, %s870_s16  ;;  %s119_s21 = sadd.s32 1, %s862_s14 }
   0x6   : > { %p30_p0 = scmp.ge.s32.totalorder %s28_s20, 2  ;;  %p129_p1 = scmp.ne.s32.totalorder %s862_s14, %s858_s13 }
   0x7   : > { %p130_p2 = scmp.eq.s32.totalorder %s673_s18, 1  ;;  %p135_p3 = scmp.ne.s32.totalorder %s858_s13, %s854_s12 }
   0x8   : > { %s1061_s20 = smov (%p30_p0, %s28_s20), 0  ;;  %p136_p5 = scmp.eq.s32.totalorder %s674_s19, 1 }
   0x9   : > { %p944_p4 = por %p130_p2, %p129_p1  ;;  %s114_s23 = ssub.s32 %s870_s16, %s1061_s20 }
   0xa   : > { %p677_p6 = scmp.ge.s32.totalorder %s874_s17, 1  ;;  %p117_p7 = scmp.eq.s32.totalorder %s114_s23, 0 }
   0xb   : > { %p951_p8 = por %p136_p5, %p135_p3  ;;  %p187_p9 = scmp.lt.s32.totalorder %s874_s17, 3 }
   0xc   : > { %s957_s25 = scalar_select %p117_p7, %s862_s14, %s119_s21  }
   0xd   : > { %p188_p10 = pnand %p677_p6, %p187_p9 }
   0xe   : > { %p229_p11 = scmp.lt.s32.totalorder (!%p188_p10), %s866_s15, 1  ;;  %s879_s4 = smov (!%p188_p10), 126  }
   0xf   : > { %191 = sbr.rel (%p188_p10) target bundleno = 403 (0x193), region = 32  ;;  %s881_s5 = smov (!%p188_p10), 127  }
  0x10   : > { %s225_s19 = sand.u32 (!%p188_p10), 1, %s858_s13  }
  0x11   : > { %s678_s21 = sshll.u32 (!%p188_p10), %s225_s19, 4 }
  0x12   : > { %s227_s23 = scalar_lea.vmem (!%p188_p10), [#allocation2], %s678_s21 }
  0x14   : > { %v876_v0 = vmov 1   ;;  %v877_v1 = vmov 0   ;;  %s962_s26 = scalar_select %p229_p11, %s866_s15, 1  ;;  %v878_v2 = vmov 2   ;;  %v880_v7 = vmov 3  }
  0x15   : > { %758 = vset.pattern.permute.xlu2 %v876_v0  ;;  %757 = vset.pattern.permute.xlu1 %v877_v1 }
  0x16   : > { %760 = vset.pattern.permute.xlu0 %v878_v2  ;;  %s691_s27 = sshll.u32 %s962_s26, 4  ;;  %s683_s6 = sshll.u32 %s962_s26, 2 }
  0x17   : > { %s246_s30 = scalar_lea.vmem %s1050_s1, %s691_s27  ;;  %s251_s9 = scalar_lea.vmem %s1051_s2, %s683_s6 }
  0x18   : > { %v329_v3 = vld [vmem:[%s246_s30] sm:$0xff]  ;;  %v330_v5 = vld [vmem:[%s246_s30 + $0x8] sm:$0xff]  ;;  %s236_s18 = scalar_lea.vmem %s1049_s0, %s691_s27  ;;  %s693_s26 = sshll.u32 %s866_s15, 4 }
  0x19   : > { %v392_v4 = vmul.f32 0.5, %v329_v3  ;;  %348 = vperm.xlu2 %758, %v329_v3   ;;  %334 = vperm.xlu1 %757, %v329_v3   ;;  %v393_v6 = vmul.f32 0.5, %v330_v5  ;;  %v981_v16 = vld [vmem:[%s251_s9] sm:$0xf]  ;;  %v254_v23 = vld [vmem:[%s236_s18 + $0x8] sm:$0xff]  ;;  %s560_s29 = scalar_lea.hbm %s1052_s3, %s693_s26  ;;  %s561_s30 = sshll.u32 %s227_s23, 4  ;;  %s562_s30 = int_to_ptr.vmem [resolvable:$true] %s561_s30 }
  0x1a   : > { %v355_v17 = vperm.slane %v981_v16, 1  ;;  %v253_v20 = vld [vmem:[%s236_s18] sm:$0xff]  ;;  %v685_v25 = vmul.f32 -1.442695, %v254_v23  ;;  %v342_v36 = vperm.slane %v981_v16, 0  ;;  %v370_v53 = vperm.slane %v981_v16, 2 }
  0x1b   : > { %396 = vrot.lane.b32.xlu0 %v392_v4, %s879_s4  ;;  %v684_v21 = vmul.f32 -1.442695, %v253_v20  ;;  %s547_s15 = scalar_lea.sflag [#allocation3], %s225_s19  ;;  %s816_s9 = scalar_lea.hbm %s1052_s3, 32 }
  0x1d   : > { %772 = vpow2.f32 %v684_v21 }
  0x21   : > { %352 = vperm.xlu2 %758, %v330_v5   ;;  %339 = vperm.xlu1 %757, %v330_v5  }
  0x23   : > { %398 = vrot.lane.b32.xlu0 %v393_v6, %s879_s4  ;;  %v773_v22 = vpop.eup %772  ;;  %s563_s4 = sshll.u32 %s560_s29, 4  ;;  %s564_s4 = int_to_ptr.hbm [resolvable:$true] %s563_s4 }
  0x24   : > { %v261_v24 = vadd.f32 1.0, %v773_v22 }
  0x26   : > { %774 = vrcp.f32 %v261_v24  ;;  %vm268_vm0 = vweird.f32 %v261_v24  ;;  %v274_v32 = vand.u32 2147483648, %v261_v24  ;;  %v272_v34 = vand.u32 2147483647, %v261_v24 }
  0x27   : > { %776 = vpow2.f32 %v685_v25 }
  0x28   : > { %v275_v39 = vor.u32 1.1754944e-38, %v274_v32  ;;  %vm273_vm3 = vcmp.eq.f32.partialorder %v272_v34, 8.507059e+37 }
  0x29   : > { %759 = vset.pattern.permute.xlu2 %v878_v2  ;;  %761 = vset.pattern.permute.xlu1 %v880_v7 }
  0x2a   : > { %363 = vperm.xlu2 %759, %v329_v3  }
  0x2c   : > { %v775_v26 = vpop.eup %774 }
  0x2d   : > { %v777_v27 = vpop.eup %776  ;;  %v264_v28 = vmul.f32 %v775_v26, %v261_v24  ;;  %vm269_vm1 = vweird.f32 %v775_v26 }
  0x2e   : > { %v262_v29 = vadd.f32 1.0, %v777_v27  ;;  %vm270_vm2 = vmor %vm268_vm0, %vm269_vm1 }
  0x2f   : > { %v265_v30 = vsub.f32 1.0, %v264_v28 }
  0x30   : > { %778 = vrcp.f32 %v262_v29  ;;  %v289_v50 = vand.u32 2147483648, %v262_v29  ;;  %vm283_vm4 = vweird.f32 %v262_v29  ;;  %v287_v54 = vand.u32 2147483647, %v262_v29 }
  0x31   : > { %v266_v31 = vmul.f32 %v775_v26, %v265_v30 }
  0x32   : > { %762 = vset.pattern.permute.xlu2 %v880_v7  ;;  %v290_v57 = vor.u32 1.1754944e-38, %v289_v50  ;;  %vm288_vm7 = vcmp.eq.f32.partialorder %v287_v54, 8.507059e+37 }
  0x33   : > { %382 = vperm.xlu2 %762, %v330_v5   ;;  %v267_v33 = vadd.f32 %v775_v26, %v266_v31 }
  0x35   : > { %v271_v42 = vsel %vm270_vm2, %v775_v26, %v267_v33 }
  0x36   : > { %v779_v35 = vpop.eup %778  ;;  %v276_v46 = vsel %vm273_vm3, %v275_v39, %v271_v42 }
  0x37   : > { %v279_v43 = vmul.f32 %v779_v35, %v262_v29  ;;  %v293_v51 = vsub.f32 1.0, %v276_v46  ;;  %vm284_vm5 = vweird.f32 %v779_v35  ;;  %v313_v63 = vadd.f32 1e-08, %v276_v46 }
  0x38   : > { %vm285_vm6 = vmor %vm283_vm4, %vm284_vm5 }
  0x39   : > { %v280_v45 = vsub.f32 1.0, %v279_v43  ;;  %v301_v60 = vadd.f32 1e-08, %v293_v51 }
  0x3b   : > { %764 = vset.pattern.permute.xlu2 %v877_v1  ;;  %v281_v48 = vmul.f32 %v779_v35, %v280_v45  ;;  %780 = vlog2.f32 %v301_v60 }
  0x3c   : > { %782 = vlog2.f32 %v313_v63 }
  0x3d   : > { %v282_v52 = vadd.f32 %v779_v35, %v281_v48 }
  0x3f   : > { %v286_v61 = vsel %vm285_vm6, %v779_v35, %v282_v52 }
  0x41   : > { %v781_v7 = vpop.eup %780 }
  0x73   : > { %v349_v18 = vpop.permute.xlu2 %348 }
  0x74   : > { %v356_v19 = vsub.f32 %v349_v18, %v355_v17 }
  0x76   : > { %v358_v37 = vand.u32 2147483647, %v356_v19 }
  0x7b   : > { %v353_v40 = vpop.permute.xlu2 %352 }
  0x7c   : > { %v357_v49 = vsub.f32 %v353_v40, %v355_v17 }
  0x7e   : > { %v359_v55 = vand.u32 2147483647, %v357_v49 }
  0x84   : > { %v364_v58 = vpop.permute.xlu2 %363 }
  0x85   : > { %v371_v62 = vsub.f32 %v364_v58, %v370_v53 }
  0x8b   : > { %v335_v38 = vpop.permute.xlu1 %334 }
  0x8c   : > { %v343_v41 = vsub.f32 %v335_v38, %v342_v36 }
  0x8d   : > { %v397_v8 = vpop.permute.xlu0 %396  ;;  %v383_v40 = vpop.permute.xlu2 %382 }
  0x8e   : > { %v402_v9 = vsub.f32 %v329_v3, %v397_v8  ;;  %v404_v10 = vadd.f32 %v397_v8, %v329_v3  ;;  %v345_v44 = vand.u32 2147483647, %v343_v41 }
  0x90   : > { %v971_v11 = vsub.f32 %v404_v10, %v402_v9  ;;  %v360_v47 = vadd.f32 %v358_v37, %v345_v44 }
  0x92   : > { %416 = vrot.lane.b32.xlu0 %v971_v11, %s881_s5 }
  0x93   : > { %v340_v56 = vpop.permute.xlu1 %339 }
  0x94   : > { %v344_v59 = vsub.f32 %v340_v56, %v342_v36  ;;  %v385_v36 = vperm.slane %v981_v16, 3 }
  0x95   : > { %v399_v12 = vpop.permute.xlu0 %398 }
  0x96   : > { %v403_v13 = vsub.f32 %v330_v5, %v399_v12  ;;  %v405_v14 = vadd.f32 %v399_v12, %v330_v5  ;;  %v297_v12 = vmul.f32 %v293_v51, %v293_v51  ;;  %v387_v41 = vsub.f32 %v383_v40, %v385_v36 }
  0x98   : > { %436 = vperm.xlu2 %764, %v405_v14   ;;  %v975_v15 = vsub.f32 %v405_v14, %v403_v13  ;;  %v311_v19 = vmul.f32 0.25, %v297_v12  ;;  %v389_v48 = vand.u32 2147483647, %v387_v41 }
  0x9a   : > { %367 = vperm.xlu0 %760, %v330_v5   ;;  %418 = vrot.lane.b32.xlu1 %v975_v15, %s881_s5  ;;  %s810_s5 = sshra.s32 %s564_s4, 4  ;;  %s811_s5 = int_to_ptr.hbm [resolvable:$true] %s810_s5 }
  0x9b   : > { %s812_s6 = scalar_lea.hbm %s811_s5, 16  ;;  %p817_p1 = scmp.lt.s32.totalorder %s811_s5, %s1052_s3 }
  0x9c   : > { %p813_p12 = scmp.ne.s32.totalorder %s811_s5, %s812_s6  ;;  %p818_p2 = scmp.lt.s32.totalorder %s816_s9, %s812_s6 }
  0x9e   : > { %p814_p13 = pnand %p813_p12, %p944_p4  ;;  %p819_p3 = por %p818_p2, %p817_p1 }
  0xa0   : > { %766 = vset.pattern.permute.xlu2 %v876_v0  ;;  %p815_p0 = pneg %p814_p13 }
  0xa1   : > { %460 = vperm.xlu2 %766, %v404_v10  }
  0xa2   : > { %765 = vset.pattern.permute.xlu0 %v877_v1  ;;  %378 = vperm.xlu1 %761, %v329_v3   ;;  %v373_v3 = vand.u32 2147483647, %v371_v62  ;;  %p820_p5 = pnand %p819_p3, %p815_p0 }
  0xa3   : > { %444 = vperm.xlu0 %765, %v402_v9  }
  0xa4   : > { %v375_v5 = vadd.f32 %v373_v3, %v360_v47 }
  0xa9   : > { %471 = vperm.xlu2 %766, %v402_v9   ;;  %v783_v9 = vpop.eup %782 }
  0xaa   : > { %763 = vset.pattern.permute.xlu1 %v877_v1 }
  0xab   : > { %768 = vset.pattern.permute.xlu0 %v876_v0  ;;  %431 = vperm.xlu1 %763, %v404_v10   ;;  %v295_v10 = vmul.f32 %v276_v46, %v276_v46 }
  0xac   : > { %475 = vperm.xlu0 %768, %v403_v13  }
  0xad   : > { %v299_v17 = vmul.f32 0.75, %v295_v10 }
  0xb1   : > { %770 = vset.pattern.permute.xlu2 %v877_v1 }
  0xb3   : > { %449 = vperm.xlu1 %763, %v403_v13   ;;  %v304_v13 = vmul.f32 0.6931472, %v781_v7 }
  0xb4   : > { %771 = vset.pattern.permute.xlu0 %v877_v1 }
  0xb5   : > { %v307_v18 = vsub.f32 0.0, %v304_v13 }
  0xb7   : > { %v309_v23 = vmul.f32 %v307_v18, %v299_v17 }
  0xbb   : > { %767 = vset.pattern.permute.xlu1 %v876_v0  ;;  %v346_v0 = vand.u32 2147483647, %v344_v59 }
  0xbc   : > { %464 = vperm.xlu1 %767, %v405_v14   ;;  %v316_v14 = vmul.f32 0.6931472, %v783_v9 }
  0xbd   : > { %v361_v2 = vadd.f32 %v359_v55, %v346_v0 }
  0xbe   : > { %v319_v20 = vsub.f32 0.0, %v316_v14 }
  0xc0   : > { %v321_v24 = vmul.f32 %v319_v20, %v311_v19 }
  0xc2   : > { %v323_v29 = vsub.f32 %v321_v24, %v309_v23 }
  0xc4   : > { %769 = vset.pattern.permute.xlu1 %v877_v1  ;;  %v291_v1 = vsel %vm288_vm7, %v290_v57, %v286_v61  ;;  %v325_v37 = vmul.f32 2.0, %v323_v29 }
  0xc5   : > { %v294_v4 = vsub.f32 1.0, %v291_v1  ;;  %v314_v6 = vadd.f32 1e-08, %v291_v1  ;;  %v296_v25 = vmul.f32 %v291_v1, %v291_v1 }
  0xc6   : > { %v327_v42 = vadd.f32 2.0, %v325_v37 }
  0xc7   : > { %v302_v8 = vadd.f32 1e-08, %v294_v4  ;;  %784 = vlog2.f32 %v314_v6  ;;  %v298_v26 = vmul.f32 %v294_v4, %v294_v4  ;;  %v300_v30 = vmul.f32 0.75, %v296_v25 }
  0xc9   : > { %786 = vlog2.f32 %v302_v8  ;;  %v312_v32 = vmul.f32 0.25, %v298_v26 }
  0xcd   : > { %v785_v21 = vpop.eup %784 }
  0xce   : > { %v318_v28 = vmul.f32 0.6931472, %v785_v21 }
  0xcf   : > { %v787_v22 = vpop.eup %786 }
  0xd0   : > { %v306_v27 = vmul.f32 0.6931472, %v787_v22  ;;  %v320_v33 = vsub.f32 0.0, %v318_v28 }
  0xd2   : > { %v308_v31 = vsub.f32 0.0, %v306_v27  ;;  %v322_v39 = vmul.f32 %v320_v33, %v312_v32 }
  0xd4   : > { %v310_v38 = vmul.f32 %v308_v31, %v300_v30 }
  0xd6   : > { %v324_v43 = vsub.f32 %v322_v39, %v310_v38 }
  0xf2   : > { %v437_v59 = vpop.permute.xlu2 %436 }
  0xfb   : > { %v461_v62 = vpop.permute.xlu2 %460 }
 0x103   : > { %v472_v13 = vpop.permute.xlu2 %471 }
 0x104   : > { %v417_v34 = vpop.permute.xlu0 %416 }
 0x105   : > { %v422_v35 = vmul.f32 %v417_v34, %v971_v11  ;;  %v326_v11 = vmul.f32 2.0, %v324_v43 }
 0x107   : > { %489 = vperm.xlu1 %769, %v422_v35   ;;  %v328_v51 = vadd.f32 2.0, %v326_v11 }
 0x10c   : > { %v419_v44 = vpop.permute.xlu1 %418  ;;  %v368_v45 = vpop.permute.xlu0 %367 }
 0x10d   : > { %v423_v46 = vmul.f32 %v419_v44, %v975_v15  ;;  %v372_v47 = vsub.f32 %v368_v45, %v370_v53  ;;  %v406_v15 = vmul.f32 0.5, %v981_v16 }
 0x10f   : > { %v374_v49 = vand.u32 2147483647, %v372_v47  ;;  %494 = vperm.xlu2 %770, %v423_v46   ;;  %534 = vperm.xlu1 %769, %v327_v42   ;;  %v408_v61 = vrot.slane %v406_v15, 2 }
 0x111   : > { %v376_v50 = vadd.f32 %v374_v49, %v361_v2  ;;  %v411_v63 = vadd.f32 %v408_v61, %v981_v16  ;;  %v410_v0 = vsub.f32 %v981_v16, %v408_v61 }
 0x113   : > { %v999_v52 = vadd.f32 %v389_v48, %v376_v50  ;;  %v424_v1 = vsub.f32 %v411_v63, %v410_v0  ;;  %v467_v3 = vperm.slane %v411_v63, 1  ;;  %v439_v4 = vperm.slane %v411_v63, 0 }
 0x114   : > { %v379_v54 = vpop.permute.xlu1 %378  ;;  %v478_v7 = vperm.slane %v410_v0, 1 }
 0x115   : > { %v386_v55 = vsub.f32 %v379_v54, %v385_v36  ;;  %v445_v60 = vpop.permute.xlu0 %444  ;;  %v426_v9 = vrot.slane %v424_v1, 1  ;;  %v441_v17 = vmin.f32 %v437_v59, %v439_v4  ;;  %v503_v16 = vmax.f32 %v437_v59, %v439_v4 }
 0x116   : > { %v479_v34 = vmax.f32 %v472_v13, %v478_v7  ;;  %v468_v37 = vmin.f32 %v461_v62, %v467_v3  ;;  %v510_v40 = vmin.f32 %v472_v13, %v478_v7  ;;  %v508_v44 = vmax.f32 %v461_v62, %v467_v3 }
 0x117   : > { %v388_v56 = vand.u32 2147483647, %v386_v55  ;;  %539 = vperm.xlu2 %770, %v328_v51   ;;  %v428_v19 = vmul.f32 %v426_v9, %v424_v1  ;;  %v527_v55 = vmul.f32 5.0, %v999_v52 }
 0x118   : > { %v481_v43 = vsub.f32 %v468_v37, %v479_v34  ;;  %v512_v49 = vsub.f32 %v508_v44, %v510_v40 }
 0x119   : > { %v1001_v57 = vadd.f32 %v388_v56, %v375_v5  ;;  %v452_v5 = vperm.slane %v410_v0, 0  ;;  %v497_v25 = vperm.slane %v428_v19, 0 }
 0x11a   : > { %v483_v50 = vmax.f32 %v481_v43, 0.0 }
 0x11b   : > { %v453_v35 = vmax.f32 %v445_v60, %v452_v5  ;;  %v504_v41 = vmin.f32 %v445_v60, %v452_v5 }
 0x11d   : > { %v432_v58 = vpop.permute.xlu1 %431 }
 0x11e   : > { %v476_v6 = vpop.permute.xlu0 %475  ;;  %v440_v33 = vmin.f32 %v432_v58, %v439_v4  ;;  %v502_v36 = vmax.f32 %v432_v58, %v439_v4 }
 0x11f   : > { %v480_v10 = vmax.f32 %v476_v6, %v478_v7  ;;  %v511_v20 = vmin.f32 %v476_v6, %v478_v7 }
 0x120   : > { %v455_v38 = vsub.f32 %v440_v33, %v453_v35  ;;  %v506_v45 = vsub.f32 %v502_v36, %v504_v41 }
 0x122   : > { %v457_v48 = vmax.f32 %v455_v38, 0.0  ;;  %v514_v51 = vmul.f32 %v512_v49, %v506_v45 }
 0x124   : > { %v485_v58 = vmul.f32 %v483_v50, %v457_v48 }
 0x125   : > { %v450_v53 = vpop.permute.xlu1 %449 }
 0x126   : > { %v454_v12 = vmax.f32 %v450_v53, %v452_v5  ;;  %v505_v21 = vmin.f32 %v450_v53, %v452_v5 }
 0x128   : > { %v456_v22 = vsub.f32 %v441_v17, %v454_v12  ;;  %v507_v26 = vsub.f32 %v503_v16, %v505_v21 }
 0x12a   : > { %v458_v27 = vmax.f32 %v456_v22, 0.0 }
 0x12e   : > { %v465_v2 = vpop.permute.xlu1 %464 }
 0x12f   : > { %v469_v8 = vmin.f32 %v465_v2, %v467_v3  ;;  %v509_v14 = vmax.f32 %v465_v2, %v467_v3  ;;  %v526_v2 = vmul.f32 5.0, %v1001_v57 }
 0x131   : > { %v482_v18 = vsub.f32 %v469_v8, %v480_v10  ;;  %v513_v23 = vsub.f32 %v509_v14, %v511_v20 }
 0x133   : > { %v484_v24 = vmax.f32 %v482_v18, 0.0  ;;  %v515_v28 = vmul.f32 %v513_v23, %v507_v26 }
 0x135   : > { %v486_v30 = vmul.f32 %v484_v24, %v458_v27  ;;  %788 = vrcp.f32 %v515_v28 }
 0x13b   : > { %v789_v39 = vpop.eup %788 }
 0x169   : > { %v495_v29 = vpop.permute.xlu2 %494 }
 0x16a   : > { %v499_v31 = vadd.f32 %v497_v25, %v495_v29 }
 0x16c   : > { %v501_v32 = vsub.f32 %v499_v31, %v486_v30 }
 0x16e   : > { %790 = vrcp.f32 %v501_v32  ;;  %v523_v47 = vmul.f32 %v789_v39, %v501_v32 }
 0x16f   : > { %792 = vrcp.f32 %v514_v51 }
 0x171   : > { %v540_v60 = vpop.permute.xlu2 %539 }
 0x174   : > { %v791_v42 = vpop.eup %790 }
 0x175   : > { %v521_v46 = vmul.f32 %v791_v42, %v486_v30  ;;  %v793_v62 = vpop.eup %792 }
 0x177   : > { %v525_v11 = vadd.f32 %v523_v47, %v521_v46 }
 0x179   : > { %v490_v54 = vpop.permute.xlu1 %489  ;;  %v529_v56 = vmul.f32 2.0, %v525_v11 }
 0x17a   : > { %v498_v59 = vadd.f32 %v497_v25, %v490_v54 }
 0x17b   : > { %v531_v15 = vsub.f32 %v527_v55, %v529_v56 }
 0x17c   : > { %v500_v53 = vsub.f32 %v498_v59, %v485_v58 }
 0x17d   : > { %v543_v61 = vadd.f32 %v540_v60, %v531_v15 }
 0x17e   : > { %794 = vrcp.f32 %v500_v53  ;;  %v522_v1 = vmul.f32 %v793_v62, %v500_v53 }
 0x17f   : > { %545 = vst [vmem:[%s227_s23 + $0x8] sm:$0xff] %v543_v61 }
 0x181   : > { %v535_v6 = vpop.permute.xlu1 %534 }
 0x184   : > { %v795_v63 = vpop.eup %794 }
 0x185   : > { %v520_v0 = vmul.f32 %v795_v63, %v485_v58 }
 0x187   : > { %v524_v52 = vadd.f32 %v522_v1, %v520_v0 }
 0x189   : > { %v528_v3 = vmul.f32 2.0, %v524_v52 }
 0x18b   : > { %v530_v4 = vsub.f32 %v526_v2, %v528_v3 }
 0x18d   : > { %v542_v7 = vadd.f32 %v535_v6, %v530_v4 }
 0x18f   : > { %544 = vst [vmem:[%s227_s23] sm:$0xff] %v542_v7 }
 0x190   : > { %823 = shalt.err (!%p820_p5)
}
 0x191   : > { %s882_s18 = smov 128   ;;  %s883_s19 = smov 8  }
 0x192   : > { %694 = dma.vmem_to_hbm [thread:$0]  (%p944_p4), %s562_s30, 256, %s564_s4, %s547_s15, %s882_s18, %s882_s18, %s883_s19  }
 0x193 PF: > { %p700_p6 = scmp.ge.s32.totalorder %s874_s17, 2  ;;  %s578_s21 = sand.u32 1, %s854_s12  }
 0x194   : > { %s579_s23 = scalar_lea.sflag [#allocation3], %s578_s21 }
 0x195   : > { %p697_p7 = pnand %p700_p6, %p951_p8 }
 0x197   : > { %p698_p9 = pneg %p697_p7 }
 0x199   : > { %849 = dma.done.wait (%p698_p9), %s579_s23, 256  }
 0x19a   : > { %851 = vsyncadd (%p698_p9), %s579_s23, 4294967040  ;;  %s16_s17 = sadd.s32 1, %s874_s17   ;;  %s1055_s12 = smov %s858_s13 }
 0x19b   : > { %p13_p10 = scmp.ge.s32.totalorder %s16_s17, 4   ;;  %s1056_s13 = smov %s862_s14 }
 0x19c   : > { %s1057_s14 = smov %s957_s25  ;;  %s1058_s15 = smov %s870_s16 }
 0x19d   : > { %s1059_s16 = smov %s1061_s20  ;;  %15 = sbr.rel (!%p13_p10) target bundleno = 4 (0x4), region = 73 }
 0x1a2   :  { %585 = vsyncpa [#allocation3], 1 }
 0x1a3   :  { %587 = vsyncpa [#allocation3 + $0x1], 1 }

</bundles_post_ra>
